<compile_context>
chip_gen: v7x
topology: tpu7x:2x2x1
jax: 0.10.0
libtpu: 0.0.40
codegen_flags: <defaults>
</compile_context>

<pallas_src>
import jax
import jax.numpy as jnp
import numpy as np
from jax.experimental import pallas as pl
from jax.experimental.pallas import tpu as pltpu


_NEG_BIG = -3.0e38                     # finite in f32 and bf16, effectively -inf
_TARGET_ROWS = 2048                    # rows fed to the MXU per grid step
_VMEM_TILE_BUDGET = 32 * 1024 * 1024   # working-set budget for tile selection
_VMEM_LIMIT_BYTES = 48 * 1024 * 1024   # explicit scoped limit, < v7x's 64 MiB


def _round_up(x, m):
    return (x + m - 1) // m * m


def _choose_tiles(B, T, Ep, Hp):
    """Pick (TB, TT): >= ~2K rows per step, inside the VMEM budget, and (when
    the batch allows it) at least two batch tiles so v7x's two TensorCores
    both get work.  TT is either the full (8-aligned) T or a multiple of 128
    so every BlockSpec stays lane-legal."""
    Bp8 = _round_up(max(B, 1), 8)
    TT = _round_up(T, 8) if T <= 512 else 512
    TB = min(_round_up(max(1, _TARGET_ROWS // TT), 8), Bp8)
    if Bp8 // TB < 2 and Bp8 >= 16:    # keep >= 2 batch tiles for megacore
        TB = max(8, _round_up(Bp8 // 2, 8))

    def tile_bytes(tb, tt):
        return (2 * tb * tt * Ep * 2   # bf16 embedding tile, double-buffered
                + Ep * Hp * 2          # bf16 W^T, single-buffered
                + 2 * tb * Hp * 4      # f32 max-accumulator block
                + 8 * Hp * 4)          # bias

    while tile_bytes(TB, TT) > _VMEM_TILE_BUDGET and TB > 8:
        TB = max(8, (TB // 2) // 8 * 8)
    while tile_bytes(TB, TT) > _VMEM_TILE_BUDGET and TT > 128:
        TT = max(128, (TT // 2) // 128 * 128)
    return TB, TT


def linear_maxpool_kernel(emb_ref, w_ref, b_ref, out_ref):
    """One (TB, TT) tile: y = emb @ W^T + b, running max over the time axis."""
    ti = pl.program_id(1)
    TB, TT, Ep = emb_ref.shape
    Hp = out_ref.shape[-1]

    # Single lane-dense MXU matmul per tile.  The (TB, TT, Ep) -> (TB*TT, Ep)
    # and (TB*TT, Hp) -> (TB, TT, Hp) reshapes are pure relabels because
    # TT % 8 == 0 and Ep, Hp % 128 == 0.
    x = emb_ref[...].reshape(TB * TT, Ep)                          # bf16
    y = jnp.dot(x, w_ref[...], preferred_element_type=jnp.float32) + b_ref[...]
    tile_max = jnp.max(y.reshape(TB, TT, Hp), axis=1)              # (TB, Hp) f32

    @pl.when(ti == 0)
    def _init():
        out_ref[...] = tile_max

    @pl.when(ti != 0)
    def _accumulate():
        out_ref[...] = jnp.maximum(out_ref[...], tile_max)


def prepare_params(emb_table, w):
    """One-time weight prep: bf16, lane-aligned table with a -BIG sentinel row,
    and bf16 W^T whose spare row E forwards the sentinel to every feature."""
    V, E = emb_table.shape
    H = w.shape[0]
    Ep = _round_up(E + 1, 128)   # guarantee >= 1 spare column for the sentinel
    Hp = _round_up(H, 128)

    tab = jnp.pad(jnp.asarray(emb_table, jnp.float32).astype(jnp.bfloat16),
                  ((0, 1), (0, Ep - E)))                           # (V+1, Ep)
    tab = tab.at[V, E].set(jnp.asarray(_NEG_BIG, jnp.bfloat16))    # sentinel row

    w_t = jnp.pad(jnp.asarray(w, jnp.float32).astype(jnp.bfloat16).T,
                  ((0, Ep - E), (0, Hp - H)))                      # (Ep, Hp)
    w_t = w_t.at[E, :].set(jnp.asarray(1.0, jnp.bfloat16))         # sentinel lane
    return tab, w_t


def bert_emb_rdm_vec_forward(ipt_ids, attn_masks, emb_table_p, w_t, b):
    """sent_vecs = max_t( (emb[ids] @ W^T + b) * mask[..., None] ) -> (B, H)."""
    B, T = ipt_ids.shape
    Vp, Ep = emb_table_p.shape
    Hp = w_t.shape[1]
    H = b.shape[0]
    sentinel = Vp - 1

    TB, TT = _choose_tiles(B, T, Ep, Hp)
    Bp = _round_up(B, TB)
    Tp = _round_up(T, TT)

    # Fold the mask into the gather: masked / padded positions fetch the
    # sentinel row, which the matmul turns into -BIG on every output feature.
    ids = jnp.where(attn_masks > 0, ipt_ids.astype(jnp.int32), jnp.int32(sentinel))
    ids = jnp.pad(ids, ((0, Bp - B), (0, Tp - T)), constant_values=sentinel)

    # Single gather straight from the bf16, lane-aligned table: this array is
    # consumed by the kernel as-is (no extra cast / pad pass over HBM).
    emb = jnp.take(emb_table_p, ids, axis=0)                       # (Bp, Tp, Ep)

    b_p = jnp.pad(b.astype(jnp.float32).reshape(1, H), ((0, 0), (0, Hp - H)))

    grid = (Bp // TB, Tp // TT)
    out = pl.pallas_call(
        linear_maxpool_kernel,
        out_shape=jax.ShapeDtypeStruct((Bp, Hp), jnp.float32),
        grid_spec=pltpu.PrefetchScalarGridSpec(
            num_scalar_prefetch=0,
            grid=grid,
            in_specs=[
                pl.BlockSpec((TB, TT, Ep), lambda bi, ti: (bi, ti, 0)),
                pl.BlockSpec((Ep, Hp), lambda bi, ti: (0, 0),
                             pipeline_mode=pl.Buffered(1)),
                pl.BlockSpec((1, Hp), lambda bi, ti: (0, 0),
                             pipeline_mode=pl.Buffered(1)),
            ],
            out_specs=pl.BlockSpec((TB, Hp), lambda bi, ti: (bi, 0)),
        ),
        compiler_params=pltpu.CompilerParams(
            dimension_semantics=("parallel", "arbitrary"),
            vmem_limit_bytes=_VMEM_LIMIT_BYTES),
    )(emb, w_t, b_p)

    out = out[:B, :H]
    # PyTorch semantics: masked positions contribute exactly 0 to the max.
    has_masked = jnp.any(attn_masks == 0, axis=1, keepdims=True)   # (B, 1)
    return jnp.where(has_masked, jnp.maximum(out, 0.0), out)


def reference_forward(ipt_ids, attn_masks, emb_table, w, b):
    """Pure-numpy BertEmb_RDMVec.tokens2vecs + max(dim=1)."""
    emb_table = np.asarray(emb_table, np.float64)
    ids = np.asarray(ipt_ids)
    w = np.asarray(w, np.float64)
    b = np.asarray(b, np.float64)
    mask = np.asarray(attn_masks, np.float64)
    emb = emb_table[ids]                                           # (B, T, E)
    outs = emb @ w.T + b                                           # (B, T, H)
    outs = outs * mask[:, :, None]                                 # outs * val_mask
    return outs.max(axis=1)                                        # .max(dim=1)[0]


if __name__ == "__main__":
    # Small shapes consistent with the module: embedding_size=300,
    # sent_hidden_size=32, batch=2, seq=8, tiny vocab.
    VOCAB, E, H, B, T = 50, 300, 32, 2, 8

    key = jax.random.PRNGKey(0)
    k_emb, k_w, k_b, k_ids = jax.random.split(key, 4)

    emb_table = jax.random.normal(k_emb, (VOCAB, E), jnp.float32) * 0.1
    lin_bound = 1.0 / np.sqrt(E)   # nn.Linear default init: U(-1/sqrt(E), 1/sqrt(E))
    w = jax.random.uniform(k_w, (H, E), jnp.float32, -lin_bound, lin_bound)
    b = jax.random.uniform(k_b, (H,), jnp.float32, -lin_bound, lin_bound)

    # Padded token ids + attention masks (right padding, as in Pad_Sequence).
    lengths = [T, 5]
    ids = np.array(jax.random.randint(k_ids, (B, T), 0, VOCAB, dtype=jnp.int32))
    attn = np.ones((B, T), dtype=np.int32)
    for row, L in enumerate(lengths):
        attn[row, L:] = 0
        ids[row, L:] = 0   # pad token id; masked out before the max anyway
    ipt_ids = jnp.asarray(ids, jnp.int32)
    attn_masks = jnp.asarray(attn, jnp.int32)

    # One-time parameter prep (bf16 lane-aligned table + W^T with sentinel lane).
    emb_table_p, w_t = prepare_params(emb_table, w)

    forward = jax.jit(bert_emb_rdm_vec_forward)
    sent_vecs = forward(ipt_ids, attn_masks, emb_table_p, w_t, b)
    sent_vecs = jax.block_until_ready(sent_vecs)

    ref = reference_forward(ids, attn, emb_table, w, b)
    # bf16 matmul inputs with f32 accumulation -> slightly looser tolerance.
    np.testing.assert_allclose(np.asarray(sent_vecs), ref, rtol=2e-2, atol=5e-3)

    print("KERNEL_OK")
</pallas_src>

<mosaic_0001>
module attributes {stable_mosaic.version = 11 : i64} {
  func.func @linear_maxpool_kernel(%arg0: i32, %arg1: i32, %arg2: memref<8x8x384xbf16, #tpu.memory_space<vmem>>, %arg3: memref<384x128xbf16, #tpu.memory_space<vmem>>, %arg4: memref<1x128xf32, #tpu.memory_space<vmem>>, %arg5: memref<8x128xf32, #tpu.memory_space<vmem>>) attributes {dimension_semantics = [#tpu.dimension_semantics<parallel>, #tpu.dimension_semantics<arbitrary>], iteration_bounds = array<i64: 1, 1>, scalar_prefetch = 0 : i64, scratch_operands = 0 : i64, tpu.core_type = #tpu.core_type<tc>, window_params = [{transform_indices = @transform_0, window_bounds = array<i64: 8, 8, 384>}, {pipeline_mode = #tpu.pipeline_mode<synchronous>, transform_indices = @transform_1, window_bounds = array<i64: 384, 128>}, {pipeline_mode = #tpu.pipeline_mode<synchronous>, transform_indices = @transform_2, window_bounds = array<i64: 1, 128>}, {transform_indices = @transform_3, window_bounds = array<i64: 8, 128>}]} {
    %c0 = arith.constant 0 : index
    %c0_0 = arith.constant 0 : index
    %c0_1 = arith.constant 0 : index
    %0 = vector.load %arg2[%c0, %c0_0, %c0_1] : memref<8x8x384xbf16, #tpu.memory_space<vmem>>, vector<8x8x384xbf16>
    %1 = vector.shape_cast %0 : vector<8x8x384xbf16> to vector<64x384xbf16>
    %c0_2 = arith.constant 0 : index
    %c0_3 = arith.constant 0 : index
    %2 = vector.load %arg3[%c0_2, %c0_3] : memref<384x128xbf16, #tpu.memory_space<vmem>>, vector<384x128xbf16>
    %cst = arith.constant dense<0.000000e+00> : vector<64x128xf32>
    %3 = tpu.matmul %1, %2, %cst {dimension_numbers = #tpu.dot_dimension_numbers<[1], [0], [0], [1], [0, 0, 1, 1], [], []>} : vector<64x384xbf16>, vector<384x128xbf16>, vector<64x128xf32> -> vector<64x128xf32>
    %c0_4 = arith.constant 0 : index
    %c0_5 = arith.constant 0 : index
    %4 = vector.load %arg4[%c0_4, %c0_5] : memref<1x128xf32, #tpu.memory_space<vmem>>, vector<1x128xf32>
    %5 = vector.broadcast %4 : vector<1x128xf32> to vector<64x128xf32>
    %6 = arith.addf %3, %5 : vector<64x128xf32>
    %7 = vector.shape_cast %6 : vector<64x128xf32> to vector<8x8x128xf32>
    %cst_6 = arith.constant dense<0xFF800000> : vector<8x128xf32>
    %8 = vector.multi_reduction <maximumf>, %7, %cst_6 [1] : vector<8x8x128xf32> to vector<8x128xf32>
    %c0_i32 = arith.constant 0 : i32
    %9 = arith.cmpi eq, %arg1, %c0_i32 : i32
    %10 = arith.extui %9 : i1 to i32
    %c0_i32_7 = arith.constant 0 : i32
    %11 = arith.cmpi ne, %10, %c0_i32_7 : i32
    scf.if %11 {
      %c0_10 = arith.constant 0 : index
      %c0_11 = arith.constant 0 : index
      %15 = vector.load %arg5[%c0_10, %c0_11] : memref<8x128xf32, #tpu.memory_space<vmem>>, vector<8x128xf32>
      tpu.vector_store %arg5[%c0_10, %c0_11], %8 {strides = array<i32>} : memref<8x128xf32, #tpu.memory_space<vmem>>, vector<8x128xf32>,
    } else {
    }
    %c0_i32_8 = arith.constant 0 : i32
    %12 = arith.cmpi ne, %arg1, %c0_i32_8 : i32
    %13 = arith.extui %12 : i1 to i32
    %c0_i32_9 = arith.constant 0 : i32
    %14 = arith.cmpi ne, %13, %c0_i32_9 : i32
    scf.if %14 {
      %c0_10 = arith.constant 0 : index
      %c0_11 = arith.constant 0 : index
      %15 = vector.load %arg5[%c0_10, %c0_11] : memref<8x128xf32, #tpu.memory_space<vmem>>, vector<8x128xf32>
      %16 = arith.maximumf %15, %8 : vector<8x128xf32>
      %c0_12 = arith.constant 0 : index
      %c0_13 = arith.constant 0 : index
      %17 = vector.load %arg5[%c0_12, %c0_13] : memref<8x128xf32, #tpu.memory_space<vmem>>, vector<8x128xf32>
      tpu.vector_store %arg5[%c0_12, %c0_13], %16 {strides = array<i32>} : memref<8x128xf32, #tpu.memory_space<vmem>>, vector<8x128xf32>,
    } else {
    }
    return
  }
  func.func @transform_0(%arg0: i32, %arg1: i32) -> (i32, i32, i32) {
    %c0_i32 = arith.constant 0 : i32
    %c0_i32_0 = arith.constant 0 : i32
    return %arg0, %arg1, %c0_i32 : i32, i32, i32
  }
  func.func @transform_1(%arg0: i32, %arg1: i32) -> (i32, i32) {
    %c0_i32 = arith.constant 0 : i32
    %c0_i32_0 = arith.constant 0 : i32
    %c0_i32_1 = arith.constant 0 : i32
    return %c0_i32, %c0_i32_0 : i32, i32
  }
  func.func @transform_2(%arg0: i32, %arg1: i32) -> (i32, i32) {
    %c0_i32 = arith.constant 0 : i32
    %c0_i32_0 = arith.constant 0 : i32
    %c0_i32_1 = arith.constant 0 : i32
    return %c0_i32, %c0_i32_0 : i32, i32
  }
  func.func @transform_3(%arg0: i32, %arg1: i32) -> (i32, i32) {
    %c0_i32 = arith.constant 0 : i32
    %c0_i32_0 = arith.constant 0 : i32
    return %arg0, %c0_i32 : i32, i32
  }
}

</mosaic_0001>

<bundles_post_ra>
// kernel: bert_emb_rdm_vec_forward.1
= control target key start
LH: loop header
LB: loop body
LE: loop exit
PB: predicated region body
PF: predicated region fallthrough
CT: control target
= control target key end

     0   :  { %vm484_vm0 = vcmask 1041409   ;;  %vm486_vm1 = vcmask 1042434   ;;  %vm488_vm2 = vcmask 1043459   ;;  %vm490_vm3 = vcmask 1044484   ;;  %s831_s1 = inlined_call_operand.vmem [shape: bf16[384,128], index: 1, kind: input, shape index: {}]   ;;  %s832_s0 = inlined_call_operand.vmem [shape: bf16[8,8,384], index: 0, kind: input, shape index: {}]   ;;  %s833_s2 = inlined_call_operand.vmem [shape: f32[1,128], index: 2, kind: input, shape index: {}]   ;;  %s834_s3 = inlined_call_operand.vmem [shape: f32[8,128], index: 3, kind: output, shape index: {}]  }
   0x1   :  { %v647_v0 = vld [vmem:[%s831_s1 + $0x40] sm:$0xff]   ;;  %v649_v2 = vld [vmem:[%s831_s1 + $0x48] sm:$0xff]   ;;  %v652_v5 = vld [vmem:[%s831_s1 + $0x50] sm:$0xff]   ;;  %vm492_vm4 = vcmask 1045509   ;;  %vm494_vm5 = vcmask 1046534   ;;  %vm496_vm6 = vcmask 1047559  }
   0x2   :  { %v648_v1 = vld [vmem:[%s831_s1] sm:$0xff]   ;;  %571 = vmatprep.subr.bf16.mxu0 %v647_v0  ;;  %v651_v4 = vld [vmem:[%s831_s1 + $0x8] sm:$0xff]   ;;  %v654_v7 = vld [vmem:[%s831_s1 + $0x10] sm:$0xff]  }
   0x3   :  { %572 = vmatpush3.bf16.msra.mxu0 %v648_v1  ;;  %v650_v3 = vld [vmem:[%s831_s1 + $0x80] sm:$0xff]   ;;  %v653_v6 = vld [vmem:[%s831_s1 + $0x88] sm:$0xff]   ;;  %v655_v8 = vld [vmem:[%s831_s1 + $0x58] sm:$0xff]  }
   0x4   :  { %573 = vmatprep.subr.bf16.mxu0 %v649_v2  ;;  %623 = vmatprep.subr.bf16.mxu1 %v650_v3  ;;  %v656_v9 = vld [vmem:[%s831_s1 + $0x90] sm:$0xff]   ;;  %v657_v10 = vld [vmem:[%s831_s1 + $0x18] sm:$0xff]   ;;  %v658_v11 = vld [vmem:[%s831_s1 + $0x60] sm:$0xff]  }
   0x5   :  { %624 = vmatpush3.bf16.msra.mxu1 %v650_v3  ;;  %v659_v12 = vld [vmem:[%s831_s1 + $0x98] sm:$0xff]   ;;  %v660_v13 = vld [vmem:[%s831_s1 + $0x20] sm:$0xff]   ;;  %v661_v15 = vld [vmem:[%s831_s1 + $0x68] sm:$0xff]  }
   0x6   :  { %625 = vmatprep.subr.bf16.mxu1 %v653_v6  ;;  %v662_v14 = vld [vmem:[%s831_s1 + $0xa0] sm:$0xff]   ;;  %v663_v16 = vld [vmem:[%s831_s1 + $0x28] sm:$0xff]   ;;  %v664_v18 = vld [vmem:[%s831_s1 + $0x70] sm:$0xff]  }
   0x7   :  { %574 = vmatpush3.bf16.msra.mxu0 %v651_v4  ;;  %v665_v17 = vld [vmem:[%s831_s1 + $0xa8] sm:$0xff]   ;;  %v666_v19 = vld [vmem:[%s831_s1 + $0x30] sm:$0xff]   ;;  %v667_v20 = vld [vmem:[%s831_s1 + $0x78] sm:$0xff]  }
   0x8   :  { %575 = vmatprep.subr.bf16.mxu0 %v652_v5  ;;  %v668_v21 = vld [vmem:[%s831_s1 + $0xb0] sm:$0xff]   ;;  %v669_v23 = vld [vmem:[%s831_s1 + $0x38] sm:$0xff]   ;;  %v670_v26 = vld [vmem:[%s832_s0] ss:$12 sps:$4 sm:$0xff]  }
   0x9   :  { %626 = vmatpush3.bf16.msra.mxu1 %v653_v6  ;;  %v672_v22 = vld [vmem:[%s832_s0 + $0x4] ss:$12 sps:$4 sm:$0xff]   ;;  %v674_v24 = vld [vmem:[%s832_s0 + $0x8] ss:$12 sps:$4 sm:$0xff]   ;;  %v673_v25 = vld [vmem:[%s831_s1 + $0xb8] sm:$0xff]  }
   0xa   :  { %627 = vmatprep.subr.bf16.mxu1 %v656_v9  ;;  %326 = vmatprep.mubr.bf16.mxu0 %v672_v22  ;;  %v676_v27 = vld [vmem:[%s832_s0 + $0x1c] ss:$12 sps:$4 sm:$0xff]   ;;  %v675_v28 = vld [vmem:[%s832_s0 + $0x20] ss:$12 sps:$4 sm:$0xff]   ;;  %v682_v29 = vld [vmem:[%s832_s0 + $0x38] ss:$12 sps:$4 sm:$0xff]  }
   0xb   :  { %576 = vmatpush3.bf16.msra.mxu0 %v654_v7  ;;  %639 = vmatprep.mubr.bf16.mxu1 %v674_v24  ;;  %v678_v30 = vld [vmem:[%s832_s0 + $0x18] ss:$12 sps:$4 sm:$0xff]   ;;  %v679_v31 = vld [vmem:[%s832_s0 + $0x34] ss:$12 sps:$4 sm:$0xff]   ;;  %v683_v32 = vld [vmem:[%s832_s0 + $0x50] ss:$12 sps:$4 sm:$0xff]  }
   0xc   :  { %577 = vmatprep.subr.bf16.mxu0 %v655_v8  ;;  %v681_v33 = vld [vmem:[%s832_s0 + $0x30] ss:$12 sps:$4 sm:$0xff]   ;;  %v684_v34 = vld [vmem:[%s832_s0 + $0x4c] ss:$12 sps:$4 sm:$0xff]   ;;  %v686_v35 = vld [vmem:[%s832_s0 + $0x48] ss:$12 sps:$4 sm:$0xff]  }
   0xd   :  { %628 = vmatpush3.bf16.msra.mxu1 %v656_v9  ;;  %v818_v38 = vld [vmem:[%s833_s2] ss:$0 sm:$0xff] }
   0xe   :  { %629 = vmatprep.subr.bf16.mxu1 %v659_v12 }
   0xf   :  { %578 = vmatpush3.bf16.msra.mxu0 %v657_v10 }
  0x10   :  { %579 = vmatprep.subr.bf16.mxu0 %v658_v11 }
  0x11   :  { %630 = vmatpush3.bf16.msra.mxu1 %v659_v12 }
  0x12   :  { %631 = vmatprep.subr.bf16.mxu1 %v662_v14 }
  0x13   :  { %580 = vmatpush3.bf16.msra.mxu0 %v660_v13 }
  0x14   :  { %581 = vmatprep.subr.bf16.mxu0 %v661_v15 }
  0x15   :  { %632 = vmatpush3.bf16.msra.mxu1 %v662_v14 }
  0x16   :  { %633 = vmatprep.subr.bf16.mxu1 %v665_v17 }
  0x17   :  { %582 = vmatpush3.bf16.msra.mxu0 %v663_v16 }
  0x18   :  { %583 = vmatprep.subr.bf16.mxu0 %v664_v18 }
  0x19   :  { %634 = vmatpush3.bf16.msra.mxu1 %v665_v17 }
  0x1a   :  { %635 = vmatprep.subr.bf16.mxu1 %v668_v21 }
  0x1b   :  { %584 = vmatpush3.bf16.msra.mxu0 %v666_v19 }
  0x1c   :  { %585 = vmatprep.subr.bf16.mxu0 %v667_v20 }
  0x1d   :  { %636 = vmatpush3.bf16.msra.mxu1 %v668_v21 }
  0x1e   :  { %637 = vmatprep.subr.bf16.mxu1 %v673_v25 }
  0x1f   :  { %586 = vmatpush3.bf16.msra.mxu0 %v669_v23 }
  0x21   :  { %638 = vmatpush3.bf16.msra.mxu1 %v673_v25 }
  0x22   :  { %327 = vmatmul.mubr.bf16.vlgmr.msra.gmra.mrb[0].mxu0 %v670_v26 }
  0x23   :  { %334 = vmatprep.mubr.bf16.mxu0 %v676_v27 }
  0x24   :  { %640 = vmatmul.mubr.bf16.vlgmr.msra.gmra.mrb[0].mxu1 %v675_v28 }
  0x25   :  { %643 = vmatprep.mubr.bf16.mxu1 %v682_v29 }
  0x2a   :  { %335 = vmatmul.mubr.bf16.gmra.mrb[4].mxu0 %v678_v30 }
  0x2b   :  { %342 = vmatprep.mubr.bf16.mxu0 %v679_v31 }
  0x2c   :  { %644 = vmatmul.mubr.bf16.gmra.mrb[4].mxu1 %v683_v32 }
  0x32   :  { %343 = vmatmul.mubr.bf16.gmra.mrb[8].mxu0 %v681_v33 }
  0x33   :  { %350 = vmatprep.mubr.bf16.mxu0 %v684_v34 }
  0x3a   :  { %351 = vmatmul.mubr.bf16.gmra.mrb[12].mxu0 %v686_v35 }
  0xf5   :  { %v587_v36 = vpop.f32.mrb[0].mxu0 }
  0xf6   :  { %v588_v37 = vpop.f32.mrb[1].mxu0 }
  0xf7   :  { %v589_v39 = vadd.f32 %v588_v37, %v587_v36  ;;  %v590_v40 = vpop.f32.mrb[2].mxu0  ;;  %v641_v42 = vpop.f32.mrb[0].mxu1 }
  0xf8   :  { %v591_v41 = vpop.f32.mrb[3].mxu0  ;;  %v393_v45 = vpop.f32.mrb[1].mxu1 }
  0xf9   :  { %v592_v43 = vadd.f32 %v591_v41, %v590_v40  ;;  %v329_v44 = vadd.f32 %v589_v39, %v818_v38  ;;  %v642_v46 = vpop.f32.mrb[2].mxu1 }
  0xfa   :  { %v396_v49 = vpop.f32.mrb[3].mxu1 }
  0xfb   :  { %v394_v47 = vadd.f32 %v393_v45, %v329_v44  ;;  %v332_v48 = vadd.f32 %v592_v43, %v818_v38 }
  0xfd   :  { %v424_v50 = vrot.slane %v394_v47, 4  ;;  %v397_v51 = vadd.f32 %v396_v49, %v332_v48  ;;  %v593_v52 = vpop.f32.mrb[4].mxu0 }
  0xfe   :  { %v594_v53 = vpop.f32.mrb[5].mxu0 }
  0xff   :  { %v425_v54 = vmax.f32 %v394_v47, %v424_v50  ;;  %v430_v55 = vrot.slane %v397_v51, 4  ;;  %v595_v56 = vadd.f32 %v594_v53, %v593_v52  ;;  %v596_v57 = vpop.f32.mrb[6].mxu0  ;;  %v645_v59 = vpop.f32.mrb[4].mxu1 }
 0x100   :  { %v597_v58 = vpop.f32.mrb[7].mxu0  ;;  %v409_v0 = vpop.f32.mrb[5].mxu1 }
 0x101   :  { %v426_v60 = vrot.slane %v425_v54, 2  ;;  %v431_v61 = vmax.f32 %v397_v51, %v430_v55  ;;  %v337_v62 = vadd.f32 %v595_v56, %v818_v38  ;;  %v598_v63 = vadd.f32 %v597_v58, %v596_v57  ;;  %v646_v1 = vpop.f32.mrb[6].mxu1 }
 0x102   :  { %v412_v6 = vpop.f32.mrb[7].mxu1 }
 0x103   :  { %v427_v2 = vmax.f32 %v425_v54, %v426_v60  ;;  %v432_v3 = vrot.slane %v431_v61, 2  ;;  %v402_v4 = vadd.f32 %v641_v42, %v337_v62  ;;  %v340_v5 = vadd.f32 %v598_v63, %v818_v38 }
 0x105   :  { %v428_v7 = vrot.slane %v427_v2, 1  ;;  %v433_v8 = vmax.f32 %v431_v61, %v432_v3  ;;  %v436_v9 = vrot.slane %v402_v4, 4  ;;  %v405_v10 = vadd.f32 %v642_v46, %v340_v5  ;;  %v599_v11 = vpop.f32.mrb[8].mxu0 }
 0x106   :  { %v600_v12 = vpop.f32.mrb[9].mxu0 }
 0x107   :  { %v434_v13 = vrot.slane %v433_v8, 1  ;;  %v437_v14 = vmax.f32 %v402_v4, %v436_v9  ;;  %v442_v15 = vrot.slane %v405_v10, 4  ;;  %v602_v16 = vpop.f32.mrb[10].mxu0  ;;  %v429_v17 = vmax.f32 %v427_v2, %v428_v7 }
 0x108   :  { %v601_v18 = vadd.f32 %v600_v12, %v599_v11  ;;  %v603_v19 = vpop.f32.mrb[11].mxu0 }
 0x109   :  { %v435_v20 = vmax.f32 %v433_v8, %v434_v13  ;;  %v438_v21 = vrot.slane %v437_v14, 2  ;;  %v443_v22 = vmax.f32 %v405_v10, %v442_v15  ;;  %v604_v23 = vadd.f32 %v603_v19, %v602_v16 }
 0x10a   :  { %v345_v24 = vadd.f32 %v601_v18, %v818_v38 }
 0x10b   :  { %v485_v25 = vsel %vm484_vm0, %v435_v20, %v429_v17  ;;  %v439_v26 = vmax.f32 %v437_v14, %v438_v21  ;;  %v444_v27 = vrot.slane %v443_v22, 2  ;;  %v348_v28 = vadd.f32 %v604_v23, %v818_v38 }
 0x10c   :  { %v410_v29 = vadd.f32 %v409_v0, %v345_v24 }
 0x10d   :  { %v440_v30 = vrot.slane %v439_v26, 1  ;;  %v445_v31 = vmax.f32 %v443_v22, %v444_v27  ;;  %v413_v32 = vadd.f32 %v412_v6, %v348_v28  ;;  %v605_v33 = vpop.f32.mrb[12].mxu0 }
 0x10e   :  { %v448_v34 = vrot.slane %v410_v29, 4  ;;  %v606_v35 = vpop.f32.mrb[13].mxu0 }
 0x10f   :  { %v441_v36 = vmax.f32 %v439_v26, %v440_v30  ;;  %v446_v37 = vrot.slane %v445_v31, 1  ;;  %v454_v39 = vrot.slane %v413_v32, 4  ;;  %v607_v40 = vadd.f32 %v606_v35, %v605_v33  ;;  %v608_v41 = vpop.f32.mrb[14].mxu0 }
 0x110   :  { %v449_v42 = vmax.f32 %v410_v29, %v448_v34  ;;  %v609_v43 = vpop.f32.mrb[15].mxu0 }
 0x111   :  { %v487_v44 = vsel %vm486_vm1, %v441_v36, %v485_v25  ;;  %v447_v45 = vmax.f32 %v445_v31, %v446_v37  ;;  %v455_v46 = vmax.f32 %v413_v32, %v454_v39  ;;  %v353_v47 = vadd.f32 %v607_v40, %v818_v38 }
 0x112   :  { %v450_v48 = vrot.slane %v449_v42, 2  ;;  %v610_v49 = vadd.f32 %v609_v43, %v608_v41 }
 0x113   :  { %v489_v50 = vsel %vm488_vm2, %v447_v45, %v487_v44  ;;  %v456_v51 = vrot.slane %v455_v46, 2  ;;  %v418_v52 = vadd.f32 %v645_v59, %v353_v47 }
 0x114   :  { %v451_v53 = vmax.f32 %v449_v42, %v450_v48  ;;  %v356_v54 = vadd.f32 %v610_v49, %v818_v38 }
 0x115   :  { %v457_v55 = vmax.f32 %v455_v46, %v456_v51  ;;  %v460_v56 = vrot.slane %v418_v52, 4 }
 0x116   :  { %v452_v57 = vrot.slane %v451_v53, 1  ;;  %v421_v58 = vadd.f32 %v646_v1, %v356_v54 }
 0x117   :  { %v458_v60 = vrot.slane %v457_v55, 1  ;;  %v461_v61 = vmax.f32 %v418_v52, %v460_v56 }
 0x118   :  { %v453_v62 = vmax.f32 %v451_v53, %v452_v57  ;;  %v466_v63 = vrot.slane %v421_v58, 4 }
 0x119   :  { %v459_v0 = vmax.f32 %v457_v55, %v458_v60  ;;  %v462_v2 = vrot.slane %v461_v61, 2 }
 0x11a   :  { %v491_v3 = vsel %vm490_vm3, %v453_v62, %v489_v50  ;;  %v467_v4 = vmax.f32 %v421_v58, %v466_v63 }
 0x11b   :  { %v493_v5 = vsel %vm492_vm4, %v459_v0, %v491_v3  ;;  %v463_v6 = vmax.f32 %v461_v61, %v462_v2 }
 0x11c   :  { %v468_v59 = vrot.slane %v467_v4, 2 }
 0x11d   :  { %v464_v7 = vrot.slane %v463_v6, 1 }
 0x11e   :  { %v469_v38 = vmax.f32 %v467_v4, %v468_v59 }
 0x11f   :  { %v465_v8 = vmax.f32 %v463_v6, %v464_v7 }
 0x120   :  { %v470_v9 = vrot.slane %v469_v38, 1 }
 0x121   :  { %v495_v10 = vsel %vm494_vm5, %v465_v8, %v493_v5 }
 0x122   :  { %v471_v1 = vmax.f32 %v469_v38, %v470_v9 }
 0x124   :  { %v497_v11 = vsel %vm496_vm6, %v471_v1, %v495_v10 }
 0x125   :  { %499 = vst [vmem:[%s834_s3] sm:$0xff] %v497_v11 }

</bundles_post_ra>
